<compile_context>
chip_gen: v7x
topology: tpu7x:2x2x1
jax: 0.10.0
libtpu: 0.0.40
codegen_flags: <defaults>
</compile_context>

<pallas_src>
import numpy as np
import jax
import jax.numpy as jnp
from jax.experimental import pallas as pl
from jax.experimental.pallas import tpu as pltpu

LANE = 128
SUBLANE = 8


def _round_up(x, m):
    return (x + m - 1) // m * m


def _pack_params(params):
    """Pre-transpose weights to [in, out], zero-pad to lane width, concatenate into
    one 8-row-aligned [rows, W] f32 slab (kept resident in VMEM)."""
    w1, b1 = params["w1"], params["b1"]   # torch nn.Linear layout: W [out, in], b [out]
    w2, b2 = params["w2"], params["b2"]
    w3, b3 = params["w3"], params["b3"]
    s, h0 = w1.shape[1], w1.shape[0]
    h1, a = w2.shape[0], w3.shape[0]
    h0p = _round_up(h0, LANE)
    h1p = _round_up(h1, LANE)
    ap = _round_up(a, LANE)
    W = max(h0p, h1p, ap)

    def pad2(m, rows, cols):
        return jnp.pad(m.astype(jnp.float32),
                       ((0, rows - m.shape[0]), (0, cols - m.shape[1])))

    sections, offsets, row = [], {}, 0

    def add(name, mat, rows):
        nonlocal row
        offsets[name] = row
        sections.append(pad2(mat, rows, W))
        row += rows

    add("w1", w1.T, _round_up(s, SUBLANE))   # [s,  h0] -> [s_pad, W]
    add("b1", b1[None, :], SUBLANE)          # [1,  h0] -> [8,     W]
    add("w2", w2.T, h0p)                     # [h0, h1] -> [h0p,   W] (zero rows beyond h0)
    add("b2", b2[None, :], SUBLANE)
    add("w3", w3.T, h1p)                     # [h1, a ] -> [h1p,   W] (zero cols beyond a)
    add("b3", b3[None, :], SUBLANE)

    slab = jnp.concatenate(sections, axis=0)
    layout = dict(offsets=offsets, s=s, a=a, h0p=h0p, h1p=h1p, ap=ap,
                  W=W, rows=row)
    return slab, layout


def _make_kernel(layout):
    o = layout["offsets"]
    s, h0p, h1p, ap = layout["s"], layout["h0p"], layout["h1p"], layout["ap"]

    def kernel(x_ref, slab_ref, mu_ref):
        x = x_ref[...]                                         # [TILE_B, s]
        # Linear(state_dim, w0) + ReLU  (zero-padded columns stay exactly 0)
        w1 = slab_ref[o["w1"]:o["w1"] + s, :h0p]
        b1 = slab_ref[o["b1"]:o["b1"] + 1, :h0p]
        h = jnp.maximum(jnp.dot(x, w1, preferred_element_type=jnp.float32) + b1, 0.0)
        # Linear(w0, w1) + ReLU  (Dropout(p=0.0) is identity); padded rows of w2 are 0
        w2 = slab_ref[o["w2"]:o["w2"] + h0p, :h1p]
        b2 = slab_ref[o["b2"]:o["b2"] + 1, :h1p]
        h = jnp.maximum(jnp.dot(h, w2, preferred_element_type=jnp.float32) + b2, 0.0)
        # Linear(w1, action_dim) + Identity; lane-dense [TILE_B, ap] store (unmasked vst)
        w3 = slab_ref[o["w3"]:o["w3"] + h1p, :ap]
        b3 = slab_ref[o["b3"]:o["b3"] + 1, :ap]
        mu_ref[...] = (jnp.dot(h, w3, preferred_element_type=jnp.float32)
                       + b3).astype(mu_ref.dtype)

    return kernel


def init_actor_params(key, state_dim, hidden_dims, action_dim):
    widths = [int(w) for w in hidden_dims.split('-')]
    assert len(widths) == 2, "this synthetic script instantiates hidden_dims='W-W'"
    k1, k2, k3 = jax.random.split(key, 3)
    w1 = jax.random.normal(k1, (widths[0], state_dim), jnp.float32) * 0.1
    b1 = jnp.zeros((widths[0],), jnp.float32) + 0.01
    w2 = jax.random.normal(k2, (widths[1], widths[0]), jnp.float32) * 0.1
    b2 = jnp.zeros((widths[1],), jnp.float32) + 0.01
    w3 = jax.random.normal(k3, (action_dim, widths[1]), jnp.float32) * 0.1
    b3 = jnp.zeros((action_dim,), jnp.float32)
    log_std = jnp.zeros((action_dim,), jnp.float32)          # matches module init
    return dict(w1=w1, b1=b1, w2=w2, b2=b2, w3=w3, b3=b3, log_std=log_std)


def actor_forward(state, params, *, tile_b=1024):
    """Equivalent of Actor.forward(state, hidden=None, stochastic=False) with
    recurrent=0, tanh=False, dropout=0.0. Returns (pi_action, hidden) like the module.

    Default tile_b=1024 keeps the per-step VMEM footprint (~1.5 MiB double-buffered)
    well inside the scoped default; raise tile_b / vmem_limit_bytes for huge batches.
    """
    batch, state_dim = state.shape
    slab, layout = _pack_params(params)
    assert layout["s"] == state_dim
    a, ap = layout["a"], layout["ap"]

    # Batch tiling: clamp tile to the (sublane-rounded) batch, pad batch to a multiple.
    tile_b = max(SUBLANE, min(tile_b, _round_up(batch, SUBLANE)))
    padded_batch = _round_up(batch, tile_b)
    state_p = state if padded_batch == batch else jnp.pad(
        state, ((0, padded_batch - batch), (0, 0)))
    grid = (padded_batch // tile_b,)

    mu_pad = pl.pallas_call(
        _make_kernel(layout),
        out_shape=jax.ShapeDtypeStruct((padded_batch, ap), jnp.float32),
        grid_spec=pltpu.PrefetchScalarGridSpec(
            num_scalar_prefetch=0,
            grid=grid,
            in_specs=[
                # state tile streams over the batch axis (auto double-buffered)
                pl.BlockSpec((tile_b, state_dim), lambda i: (i, 0)),
                # packed parameter slab: constant index_map -> stays resident
                pl.BlockSpec((layout["rows"], layout["W"]), lambda i: (0, 0)),
            ],
            out_specs=pl.BlockSpec((tile_b, ap), lambda i: (i, 0)),
        ),
        compiler_params=pltpu.CompilerParams(dimension_semantics=("parallel",)),
    )(state_p, slab)

    mu = mu_pad[:batch, :a]
    pi_action = mu            # stochastic=False -> pi_action = mu (rsample path unused)
    hidden = None             # forward_ff returns h = None
    # TODO(synk): stochastic=True rsample path (needs pltpu PRNG) and the tanh
    # log-prob correction are not implemented (module defaults use neither).
    return pi_action, hidden


def actor_forward_ref(state, params):
    """Pure-JAX reference mirroring the PyTorch module (stochastic=False)."""
    h1 = jnp.maximum(state @ params["w1"].T + params["b1"], 0.0)
    h2 = jnp.maximum(h1 @ params["w2"].T + params["b2"], 0.0)
    mu = h2 @ params["w3"].T + params["b3"]
    return mu, None


if __name__ == "__main__":
    state_dim, action_dim = 16, 3
    hidden_dims = "32-32"
    batch = 100       # not a multiple of tile_b -> exercises wrapper-side batch padding
    tile_b = 32       # >1 grid step so the BlockSpec pipeline is actually exercised

    key = jax.random.PRNGKey(0)
    k_param, k_state = jax.random.split(key)
    params = init_actor_params(k_param, state_dim, hidden_dims, action_dim)
    state = jax.random.normal(k_state, (batch, state_dim), jnp.float32)

    pi_action, hidden = actor_forward(state, params, tile_b=tile_b)
    jax.block_until_ready(pi_action)

    pi_ref, _ = actor_forward_ref(state, params)
    np.testing.assert_allclose(np.asarray(pi_action), np.asarray(pi_ref),
                               rtol=1e-5, atol=1e-5)
    assert hidden is None
    assert pi_action.shape == (batch, action_dim)

    print("KERNEL_OK")
</pallas_src>

<mosaic_0001>
module attributes {stable_mosaic.version = 11 : i64} {
  func.func @kernel(%arg0: i32, %arg1: memref<32x16xf32, #tpu.memory_space<vmem>>, %arg2: memref<296x128xf32, #tpu.memory_space<vmem>>, %arg3: memref<32x128xf32, #tpu.memory_space<vmem>>) attributes {dimension_semantics = [#tpu.dimension_semantics<parallel>], iteration_bounds = array<i64: 4>, scalar_prefetch = 0 : i64, scratch_operands = 0 : i64, tpu.core_type = #tpu.core_type<tc>, window_params = [{transform_indices = @transform_0, window_bounds = array<i64: 32, 16>}, {pipeline_mode = #tpu.pipeline_mode<synchronous>, transform_indices = @transform_1, window_bounds = array<i64: 296, 128>}, {transform_indices = @transform_2, window_bounds = array<i64: 32, 128>}]} {
    %c0 = arith.constant 0 : index
    %c0_0 = arith.constant 0 : index
    %0 = vector.load %arg1[%c0, %c0_0] : memref<32x16xf32, #tpu.memory_space<vmem>>, vector<32x16xf32>
    %c0_1 = arith.constant 0 : index
    %c0_2 = arith.constant 0 : index
    %1 = vector.load %arg2[%c0_1, %c0_2] : memref<296x128xf32, #tpu.memory_space<vmem>>, vector<16x128xf32>
    %c16 = arith.constant 16 : index
    %c0_3 = arith.constant 0 : index
    %2 = vector.load %arg2[%c16, %c0_3] : memref<296x128xf32, #tpu.memory_space<vmem>>, vector<1x128xf32>
    %cst = arith.constant dense<0.000000e+00> : vector<32x128xf32>
    %3 = tpu.matmul %0, %1, %cst {dimension_numbers = #tpu.dot_dimension_numbers<[1], [0], [0], [1], [0, 0, 1, 1], [], []>} : vector<32x16xf32>, vector<16x128xf32>, vector<32x128xf32> -> vector<32x128xf32>
    %4 = vector.broadcast %2 : vector<1x128xf32> to vector<32x128xf32>
    %5 = arith.addf %3, %4 : vector<32x128xf32>
    %cst_4 = arith.constant 0.000000e+00 : f32
    %6 = vector.broadcast %cst_4 : f32 to vector<32x128xf32>
    %7 = arith.maximumf %5, %6 : vector<32x128xf32>
    %c24 = arith.constant 24 : index
    %c0_5 = arith.constant 0 : index
    %8 = vector.load %arg2[%c24, %c0_5] : memref<296x128xf32, #tpu.memory_space<vmem>>, vector<128x128xf32>
    %c152 = arith.constant 152 : index
    %c0_6 = arith.constant 0 : index
    %9 = vector.load %arg2[%c152, %c0_6] : memref<296x128xf32, #tpu.memory_space<vmem>>, vector<1x128xf32>
    %cst_7 = arith.constant dense<0.000000e+00> : vector<32x128xf32>
    %10 = tpu.matmul %7, %8, %cst_7 {dimension_numbers = #tpu.dot_dimension_numbers<[1], [0], [0], [1], [0, 0, 1, 1], [], []>} : vector<32x128xf32>, vector<128x128xf32>, vector<32x128xf32> -> vector<32x128xf32>
    %11 = vector.broadcast %9 : vector<1x128xf32> to vector<32x128xf32>
    %12 = arith.addf %10, %11 : vector<32x128xf32>
    %cst_8 = arith.constant 0.000000e+00 : f32
    %13 = vector.broadcast %cst_8 : f32 to vector<32x128xf32>
    %14 = arith.maximumf %12, %13 : vector<32x128xf32>
    %c160 = arith.constant 160 : index
    %c0_9 = arith.constant 0 : index
    %15 = vector.load %arg2[%c160, %c0_9] : memref<296x128xf32, #tpu.memory_space<vmem>>, vector<128x128xf32>
    %c288 = arith.constant 288 : index
    %c0_10 = arith.constant 0 : index
    %16 = vector.load %arg2[%c288, %c0_10] : memref<296x128xf32, #tpu.memory_space<vmem>>, vector<1x128xf32>
    %cst_11 = arith.constant dense<0.000000e+00> : vector<32x128xf32>
    %17 = tpu.matmul %14, %15, %cst_11 {dimension_numbers = #tpu.dot_dimension_numbers<[1], [0], [0], [1], [0, 0, 1, 1], [], []>} : vector<32x128xf32>, vector<128x128xf32>, vector<32x128xf32> -> vector<32x128xf32>
    %18 = vector.broadcast %16 : vector<1x128xf32> to vector<32x128xf32>
    %19 = arith.addf %17, %18 : vector<32x128xf32>
    %c0_12 = arith.constant 0 : index
    %c0_13 = arith.constant 0 : index
    %20 = vector.load %arg3[%c0_12, %c0_13] : memref<32x128xf32, #tpu.memory_space<vmem>>, vector<32x128xf32>
    tpu.vector_store %arg3[%c0_12, %c0_13], %19 {strides = array<i32>} : memref<32x128xf32, #tpu.memory_space<vmem>>, vector<32x128xf32>,
    return
  }
  func.func @transform_0(%arg0: i32) -> (i32, i32) {
    %c0_i32 = arith.constant 0 : i32
    %c0_i32_0 = arith.constant 0 : i32
    return %arg0, %c0_i32 : i32, i32
  }
  func.func @transform_1(%arg0: i32) -> (i32, i32) {
    %c0_i32 = arith.constant 0 : i32
    %c0_i32_0 = arith.constant 0 : i32
    %c0_i32_1 = arith.constant 0 : i32
    return %c0_i32, %c0_i32_0 : i32, i32
  }
  func.func @transform_2(%arg0: i32) -> (i32, i32) {
    %c0_i32 = arith.constant 0 : i32
    %c0_i32_0 = arith.constant 0 : i32
    return %arg0, %c0_i32 : i32, i32
  }
}

</mosaic_0001>

<bundles_post_ra>
// kernel: tpu_custom_call.1
= control target key start
LH: loop header
LB: loop body
LE: loop exit
PB: predicated region body
PF: predicated region fallthrough
CT: control target
= control target key end

     0   :  { %7 = vsyncpa [#allocation3], 0  ;;  %s1115_s0 = inlined_call_operand.vmem [shape: f32[128,16], index: 0, kind: input, shape index: {}]   ;;  %s1116_s1 = inlined_call_operand.hbm [shape: f32[296,128], index: 1, kind: input, shape index: {}]   ;;  %s1117_s2 = inlined_call_operand.hbm [shape: f32[128,128], index: 2, kind: output, shape index: {}]  }
   0x1   :  { %8 = vsyncpa [#allocation4], 0 }
   0x2   :  { %10 = vsyncpa [#allocation4 + $0x1], 0  ;;  %s974_s9 = smov 0   ;;  %s976_s10 = smov 0  }
   0x3   :  { %s978_s11 = smov 0   ;;  %s980_s12 = smov 0  }
   0x4 LB: > { %s995_s13 = sadd.s32 4294967295, %s951_s12   ;;  %s581_s14 = sadd.s32 4294967294, %s951_s12   ;;  %s951_s12 = sphi %s980_s12, %s1133_s12   ;;  %s947_s11 = sphi %s978_s11, %s1132_s11   ;;  %s943_s10 = sphi %s976_s10, %s1131_s10   ;;  %s939_s9 = sphi %s974_s9, %s1130_s9  }
   0x5   : > { %s999_s15 = sadd.s32 1, %s951_s12   ;;  %s70_s16 = sadd.s32 1, %s947_s11 }
   0x6   : > { %s67_s17 = ssub.s32 %s951_s12, %s999_s15  ;;  %p80_p0 = scmp.ne.s32.totalorder %s947_s11, %s943_s10 }
   0x7   : > { %p68_p1 = scmp.eq.s32.totalorder %s67_s17, 0  ;;  %p81_p2 = scmp.eq.s32.totalorder %s995_s13, 3 }
   0x8   : > { %p86_p3 = scmp.ne.s32.totalorder %s943_s10, %s939_s9  ;;  %p87_p4 = scmp.eq.s32.totalorder %s581_s14, 3 }
   0x9   : > { %s1010_s18 = scalar_select %p68_p1, %s947_s11, %s70_s16  }
   0xa   : > { %p1012_p5 = por %p81_p2, %p80_p0  ;;  %p1016_p6 = por %p87_p4, %p86_p3 }
   0xb   : > { %p582_p7 = scmp.ge.s32.totalorder %s951_s12, 1  ;;  %p94_p8 = scmp.lt.s32.totalorder %s951_s12, 5 }
   0xc   : > { %s1121_s19 = scalar_select %p1012_p5, 1, 0 }
   0xd   : > { %s1122_s20 = scalar_select %p1016_p6, 1, 0 }
   0xe   : > { %p1118_p9 = scmp.eq.s32.totalorder %s995_s13, 0  ;;  %p1023_p10 = pnand %p582_p7, %p94_p8 }
   0xf   : > { %s953_s22 = smov [#allocation2]   ;;  %s857_s27 = scalar_lea.hbm %s1116_s1, 4736 }
  0x10   : > { %s1123_s21 = scalar_select %p1023_p10, 1, 0 }
  0x11   : > { %s106_s23 = sshll.u32 %s953_s22, 4  ;;  %p809_p11 = pneg %p1023_p10  ;;  %s107_s23 = int_to_ptr.vmem [resolvable:$true] %s106_s23 }
  0x12   : > { %p858_p13 = scmp.ne.s32.totalorder %s1116_s1, %s857_s27  ;;  %p864_p3 = scmp.lt.u32.totalorder %s857_s27, %s1116_s1 }
  0x13   : > { %p1031_p12 = pnand %p1118_p9, %p809_p11 }
  0x15   : > { %p859_p0 = pneg %p1031_p12 }
  0x17   : > { %p860_p1 = pnand %p859_p0, %p858_p13 }
  0x19   : > { %p861_p2 = pneg %p860_p1 }
  0x1b   : > { %p866_p4 = pnand %p864_p3, %p861_p2 }
  0x1d   : > { %869 = shalt.err (!%p866_p4)
}
  0x1e   : > { %s870_s4 = scalar_lea.vmem %s107_s23, 4736  ;;  %p878_p9 = scmp.lt.s32.totalorder %s107_s23, %s107_s23 }
  0x1f   : > { %p871_p7 = scmp.ne.s32.totalorder %s107_s23, %s870_s4  ;;  %p879_p6 = scmp.lt.s32.totalorder %s870_s4, %s870_s4 }
  0x21   : > { %p873_p8 = pnand %p871_p7, %p859_p0  ;;  %p880_p5 = por %p879_p6, %p878_p9 }
  0x23   : > { %p874_p11 = pneg %p873_p8 }
  0x25   : > { %p881_p10 = pnand %p880_p5, %p874_p11 }
  0x27   : > { %884 = shalt.err (!%p881_p10)
}
  0x28   : > { %s954_s5 = smov 128   ;;  %s955_s6 = smov 8  }
  0x29   : > { %812 = dma.hbm_to_vmem [thread:$0]  (!%p1031_p12), %s1116_s1, 4736, %s107_s23, [#allocation3], %s954_s5, %s954_s5, %s955_s6  }
  0x2a   : > { %p1125_p13 = scmp.ne.s32.totalorder %s1123_s21, 0 }
  0x2b   : > { %p1126_p1 = scmp.eq.s32.totalorder (!%p1125_p13), %s995_s13, 0 }
  0x2c   : > { %131 = sbr.rel (%p1125_p13) target bundleno = 730 (0x2da), region = 28 }
  0x33   : > { %930 = dma.done.wait (%p1126_p1), [#allocation3], 4736   ;;  %p1127_p0 = pmov %p1126_p1 }
  0x34   : > { %s588_s14 = sshll.u32 %s995_s13, 2  ;;  %vm171_vm0 = vcmask 130048   ;;  %v164_v0 = vld [vmem:[#allocation2] sm:$0xff]  ;;  %v165_v1 = vld [vmem:[#allocation2 + $0x8] sm:$0xff]  ;;  %v273_v4 = vld [vmem:[#allocation2 + $0x18] sm:$0xff]  ;;  %s150_s21 = sand.u32 1, %s943_s10  }
  0x35   : > { %932 = vsyncadd (%p1127_p0), [#allocation3], 4294962560  ;;  %p154_p5 = scmp.lt.s32.totalorder %s588_s14, 15  ;;  %v735_v3 = vpack.c.bf16 %v165_v1, %v164_v0  ;;  %v274_v5 = vld [vmem:[#allocation2 + $0x20] sm:$0xff]  ;;  %v275_v6 = vld [vmem:[#allocation2 + $0x28] sm:$0xff]  ;;  %s587_s23 = sshll.u32 %s150_s21, 5 }
  0x36   : > { %v739_v7 = vpack.c.bf16 %v274_v5, %v273_v4  ;;  %v276_v8 = vld [vmem:[#allocation2 + $0x30] sm:$0xff]  ;;  %v277_v11 = vld [vmem:[#allocation2 + $0x38] sm:$0xff]  ;;  %v278_v12 = vld [vmem:[#allocation2 + $0x40] sm:$0xff]  ;;  %s152_s25 = scalar_lea.vmem [#allocation5], %s587_s23  ;;  %s602_s27 = sshll.u32 %s995_s13, 9 }
  0x37   : > { %s1135_s14 = smov (!%p154_p5, %s588_s14), 15  ;;  %736 = vmatprep.subr.bf16.mxu0 %v735_v3  ;;  %v743_v10 = vpack.c.bf16 %v276_v8, %v275_v6  ;;  %v747_v14 = vpack.c.bf16 %v278_v12, %v277_v11  ;;  %v279_v16 = vld [vmem:[#allocation2 + $0x48] sm:$0xff]  ;;  %v280_v17 = vld [vmem:[#allocation2 + $0x50] sm:$0xff]  ;;  %v281_v19 = vld [vmem:[#allocation2 + $0x58] sm:$0xff]  ;;  %s507_s26 = sshll.u32 %s152_s25, 4  ;;  %s1067_s26 = int_to_ptr.vmem [resolvable:$true] %s507_s26 }
  0x38   : > { %s589_s16 = sshll.u32 %s1135_s14, 3  ;;  %738 = vmatpush3.bf16.msra.mxu0 %v735_v3  ;;  %740 = vmatprep.subr.bf16.mxu1 %v739_v7  ;;  %v751_v18 = vpack.c.bf16 %v280_v17, %v279_v16  ;;  %v282_v20 = vld [vmem:[#allocation2 + $0x60] sm:$0xff]  ;;  %v283_v22 = vld [vmem:[#allocation2 + $0x68] sm:$0xff]  ;;  %v284_v23 = vld [vmem:[#allocation2 + $0x70] sm:$0xff]  ;;  %s1072_s30 = scalar_lea.hbm %s1117_s2, %s602_s27 }
  0x39   : > { %s157_s24 = scalar_lea.vmem %s1115_s0, %s589_s16  ;;  %742 = vmatpush3.bf16.msra.mxu1 %v739_v7  ;;  %v755_v21 = vpack.c.bf16 %v282_v20, %v281_v19  ;;  %v759_v24 = vpack.c.bf16 %v284_v23, %v283_v22  ;;  %v285_v25 = vld [vmem:[#allocation2 + $0x78] sm:$0xff]  ;;  %v286_v26 = vld [vmem:[#allocation2 + $0x80] sm:$0xff]  ;;  %v287_v28 = vld [vmem:[#allocation2 + $0x88] sm:$0xff]  ;;  %s1074_s3 = scalar_lea.sflag [#allocation4], %s150_s21 }
  0x3a   : > { %v160_v2 = vld [vmem:[%s157_s24] sm:$0xff]  ;;  %v161_v9 = vld [vmem:[%s157_s24 + $0x8] sm:$0xff]  ;;  %v162_v13 = vld [vmem:[%s157_s24 + $0x10] sm:$0xff]  ;;  %744 = vmatprep.subr.bf16.mxu1 %v743_v10  ;;  %v763_v27 = vpack.c.bf16 %v286_v26, %v285_v25  ;;  %s885_s13 = scalar_lea.vmem %s1067_s26, 512  ;;  %p1128_p9 = scmp.ne.s32.totalorder %s1121_s19, 0 }
  0x3b   : > { %653 = vmatprep.mubr.msk.f32.mxu0 %vm171_vm0, %v160_v2  ;;  %v163_v15 = vld [vmem:[%s157_s24 + $0x18] sm:$0xff]  ;;  %v288_v29 = vld [vmem:[#allocation2 + $0x90] sm:$0xff]  ;;  %v383_v31 = vld [vmem:[#allocation2 + $0xa0] sm:$0xff]  ;;  %p886_p6 = scmp.ne.s32.totalorder %s1067_s26, %s885_s13  ;;  %s956_s4 = smov [#allocation5]  }
  0x3c   : > { %654 = vmatmul.mubr.msk.f32.vlgmr.msra.gmra.mrb[0].mxu0 %vm171_vm0, %v161_v9  ;;  %v767_v30 = vpack.c.bf16 %v288_v29, %v287_v28  ;;  %v384_v32 = vld [vmem:[#allocation2 + $0xa8] sm:$0xff]  ;;  %v385_v33 = vld [vmem:[#allocation2 + $0xb0] sm:$0xff]  ;;  %v386_v35 = vld [vmem:[#allocation2 + $0xb8] sm:$0xff]  ;;  %s889_s5 = sshll.u32 %s956_s4, 4  ;;  %s890_s5 = int_to_ptr.vmem [resolvable:$false] %s889_s5 }
  0x3d   : > { %656 = vmatprep.mubr.msk.f32.mxu0 %vm171_vm0, %v162_v13  ;;  %746 = vmatpush3.bf16.msra.mxu1 %v743_v10  ;;  %v771_v34 = vpack.c.bf16 %v384_v32, %v383_v31  ;;  %v775_v36 = vpack.c.bf16 %v386_v35, %v385_v33  ;;  %v387_v37 = vld [vmem:[#allocation2 + $0xc0] sm:$0xff]  ;;  %v388_v38 = vld [vmem:[#allocation2 + $0xc8] sm:$0xff]  ;;  %v389_v40 = vld [vmem:[#allocation2 + $0xd0] sm:$0xff]  ;;  %p887_p10 = pnand %p886_p6, %p1128_p9  ;;  %s891_s6 = scalar_lea.vmem %s890_s5, 1024 }
  0x3e   : > { %748 = vmatprep.subr.bf16.mxu1 %v747_v14  ;;  %v779_v39 = vpack.c.bf16 %v388_v38, %v387_v37  ;;  %v390_v41 = vld [vmem:[#allocation2 + $0xd8] sm:$0xff]  ;;  %v391_v43 = vld [vmem:[#allocation2 + $0xe0] sm:$0xff]  ;;  %v392_v44 = vld [vmem:[#allocation2 + $0xe8] sm:$0xff]  ;;  %p892_p2 = scmp.lt.s32.totalorder %s1067_s26, %s890_s5  ;;  %p893_p3 = scmp.lt.s32.totalorder %s891_s6, %s885_s13 }
  0x3f   : > { %772 = vmatprep.subr.bf16.mxu0 %v771_v34  ;;  %v783_v42 = vpack.c.bf16 %v390_v41, %v389_v40  ;;  %v787_v45 = vpack.c.bf16 %v392_v44, %v391_v43  ;;  %v393_v46 = vld [vmem:[#allocation2 + $0xf0] sm:$0xff]  ;;  %v394_v47 = vld [vmem:[#allocation2 + $0xf8] sm:$0xff]  ;;  %v395_v49 = vld [vmem:[#allocation2 + $0x100] sm:$0xff]  ;;  %p888_p12 = pneg %p887_p10 }
  0x40   : > { %657 = vmatmul.mubr.msk.f32.gmra.mrb[2].mxu0 %vm171_vm0, %v163_v15  ;;  %v791_v48 = vpack.c.bf16 %v394_v47, %v393_v46  ;;  %v396_v50 = vld [vmem:[#allocation2 + $0x108] sm:$0xff]  ;;  %v590_v52 = vld [vmem:[#allocation2 + $0x10] ss:$0 sm:$0xff]  ;;  %v398_v2 = vld [vmem:[#allocation2 + $0x118] sm:$0xff]  ;;  %p894_p4 = por %p893_p3, %p892_p2 }
  0x41   : > { %750 = vmatpush3.bf16.msra.mxu1 %v747_v14  ;;  %774 = vmatpush3.bf16.msra.mxu0 %v771_v34  ;;  %v795_v51 = vpack.c.bf16 %v396_v50, %v395_v49  ;;  %v397_v1 = vld [vmem:[#allocation2 + $0x110] sm:$0xff]  ;;  %v595_v4 = vld [vmem:[#allocation2 + $0x98] ss:$0 sm:$0xff]  ;;  %v596_v17 = vld [vmem:[#allocation2 + $0x120] ss:$0 sm:$0xff] }
  0x42   : > { %752 = vmatprep.subr.bf16.mxu1 %v751_v18  ;;  %776 = vmatprep.subr.bf16.mxu0 %v775_v36  ;;  %v799_v3 = vpack.c.bf16 %v398_v2, %v397_v1  ;;  %p895_p7 = pnand %p894_p4, %p888_p12 }
  0x45   : > { %754 = vmatpush3.bf16.msra.mxu1 %v751_v18  ;;  %778 = vmatpush3.bf16.msra.mxu0 %v775_v36 }
  0x46   : > { %756 = vmatprep.subr.bf16.mxu1 %v755_v21  ;;  %780 = vmatprep.subr.bf16.mxu0 %v779_v39 }
  0x49   : > { %758 = vmatpush3.bf16.msra.mxu1 %v755_v21  ;;  %782 = vmatpush3.bf16.msra.mxu0 %v779_v39 }
  0x4a   : > { %760 = vmatprep.subr.bf16.mxu1 %v759_v24  ;;  %784 = vmatprep.subr.bf16.mxu0 %v783_v42 }
  0x4d   : > { %762 = vmatpush3.bf16.msra.mxu1 %v759_v24  ;;  %786 = vmatpush3.bf16.msra.mxu0 %v783_v42 }
  0x4e   : > { %764 = vmatprep.subr.bf16.mxu1 %v763_v27  ;;  %788 = vmatprep.subr.bf16.mxu0 %v787_v45 }
  0x51   : > { %766 = vmatpush3.bf16.msra.mxu1 %v763_v27  ;;  %790 = vmatpush3.bf16.msra.mxu0 %v787_v45 }
  0x52   : > { %768 = vmatprep.subr.bf16.mxu1 %v767_v30  ;;  %792 = vmatprep.subr.bf16.mxu0 %v791_v48 }
  0x55   : > { %770 = vmatpush3.bf16.msra.mxu1 %v767_v30  ;;  %794 = vmatpush3.bf16.msra.mxu0 %v791_v48 }
  0x56   : > { %796 = vmatprep.subr.bf16.mxu0 %v795_v51 }
  0x59   : > { %798 = vmatpush3.bf16.msra.mxu0 %v795_v51 }
  0x5a   : > { %800 = vmatprep.subr.bf16.mxu0 %v799_v3 }
  0x5d   : > { %802 = vmatpush3.bf16.msra.mxu0 %v799_v3 }
 0x10f   : > { %v655_v53 = vpop.f32.mrb[0].mxu0 }
 0x110   : > { %v256_v54 = vadd.f32 %v655_v53, %v590_v52  ;;  %v250_v55 = vpop.f32.mrb[1].mxu0 }
 0x111   : > { %v251_v56 = vadd.f32 %v590_v52, %v250_v55 }
 0x112   : > { %v270_v59 = vmax.f32 %v256_v54, 0.0 }
 0x113   : > { %v658_v57 = vpop.f32.mrb[2].mxu0  ;;  %v269_v58 = vmax.f32 %v251_v56, 0.0 }
 0x114   : > { %v266_v60 = vadd.f32 %v658_v57, %v590_v52  ;;  %v260_v61 = vpop.f32.mrb[3].mxu0 }
 0x115   : > { %v261_v62 = vadd.f32 %v590_v52, %v260_v61  ;;  %691 = vmatprep.mubr.f32.mxu1 %v269_v58 }
 0x116   : > { %692 = vmatmul.mubr.f32.vlgmr.msra.gmra.mrb[0].mxu1 %v270_v59  ;;  %v272_v0 = vmax.f32 %v266_v60, 0.0 }
 0x117   : > { %v271_v63 = vmax.f32 %v261_v62, 0.0 }
 0x119   : > { %694 = vmatprep.mubr.f32.mxu1 %v271_v63 }
 0x11a   : > { %695 = vmatmul.mubr.f32.gmra.mrb[2].mxu1 %v272_v0 }
 0x1e9   : > { %v693_v5 = vpop.f32.mrb[0].mxu1 }
 0x1ea   : > { %v366_v6 = vadd.f32 %v693_v5, %v595_v4  ;;  %v360_v7 = vpop.f32.mrb[1].mxu1 }
 0x1eb   : > { %v361_v8 = vadd.f32 %v595_v4, %v360_v7 }
 0x1ec   : > { %v380_v11 = vmax.f32 %v366_v6, 0.0 }
 0x1ed   : > { %v379_v9 = vmax.f32 %v361_v8, 0.0  ;;  %v696_v10 = vpop.f32.mrb[2].mxu1 }
 0x1ee   : > { %v376_v12 = vadd.f32 %v696_v10, %v595_v4  ;;  %v370_v13 = vpop.f32.mrb[3].mxu1 }
 0x1ef   : > { %v371_v14 = vadd.f32 %v595_v4, %v370_v13  ;;  %729 = vmatprep.mubr.f32.mxu0 %v379_v9 }
 0x1f0   : > { %730 = vmatmul.mubr.f32.vlgmr.msra.gmra.mrb[4].mxu0 %v380_v11  ;;  %v382_v16 = vmax.f32 %v376_v12, 0.0 }
 0x1f1   : > { %v381_v15 = vmax.f32 %v371_v14, 0.0 }
 0x1f3   : > { %732 = vmatprep.mubr.f32.mxu0 %v381_v15 }
 0x1f4   : > { %733 = vmatmul.mubr.f32.gmra.mrb[6].mxu0 %v382_v16 }
 0x2c3   : > { %v731_v18 = vpop.f32.mrb[4].mxu0 }
 0x2c4   : > { %v476_v19 = vadd.f32 %v731_v18, %v596_v17  ;;  %v470_v20 = vpop.f32.mrb[5].mxu0 }
 0x2c5   : > { %v471_v21 = vadd.f32 %v596_v17, %v470_v20 }
 0x2c6   : > { %490 = vst [vmem:[%s152_s25 + $0x8] sm:$0xff] %v476_v19 }
 0x2c7   : > { %489 = vst [vmem:[%s152_s25] sm:$0xff] %v471_v21  ;;  %v734_v22 = vpop.f32.mrb[6].mxu0 }
 0x2c8   : > { %v486_v23 = vadd.f32 %v734_v22, %v596_v17  ;;  %v480_v24 = vpop.f32.mrb[7].mxu0 }
 0x2c9   : > { %v481_v25 = vadd.f32 %v596_v17, %v480_v24 }
 0x2ca   : > { %492 = vst [vmem:[%s152_s25 + $0x18] sm:$0xff] %v486_v23 }
 0x2cb   : > { %491 = vst [vmem:[%s152_s25 + $0x10] sm:$0xff] %v481_v25 }
 0x2cc   : > { %898 = shalt.err (!%p895_p7)
}
 0x2cd   : > { %s899_s7 = scalar_lea.hbm %s1072_s30, 512  ;;  %s903_s16 = scalar_lea.hbm %s1117_s2, 2048 }
 0x2ce   : > { %p900_p8 = scmp.ne.s32.totalorder %s1072_s30, %s899_s7  ;;  %p904_p1 = scmp.lt.u32.totalorder %s1072_s30, %s1117_s2 }
 0x2cf   : > { %p905_p0 = scmp.lt.u32.totalorder %s903_s16, %s899_s7  ;;  %p907_p6 = scmp.lt.u32.totalorder %s899_s7, %s1072_s30 }
 0x2d0   : > { %p901_p11 = pnand %p900_p8, %p1128_p9 }
 0x2d1   : > { %p906_p5 = por %p905_p0, %p904_p1 }
 0x2d2   : > { %p902_p13 = pneg %p901_p11 }
 0x2d3   : > { %p908_p10 = por %p907_p6, %p906_p5 }
 0x2d5   : > { %p909_p12 = pnand %p908_p10, %p902_p13 }
 0x2d7   : > { %912 = shalt.err (!%p909_p12)
}
 0x2d8   : > { %s957_s24 = smov 128   ;;  %s958_s21 = smov 8  }
 0x2d9   : > { %807 = dma.vmem_to_hbm [thread:$0]  (%p1128_p9), %s1067_s26, 512, %s1072_s30, %s1074_s3, %s957_s24, %s957_s24, %s958_s21  }
 0x2da PF: > { %p819_p2 = scmp.ge.s32.totalorder %s951_s12, 2  ;;  %s522_s23 = sand.u32 1, %s939_s9  }
 0x2db   : > { %p1129_p3 = scmp.ne.s32.totalorder %s1122_s20, 0  ;;  %s523_s25 = scalar_lea.sflag [#allocation4], %s522_s23 }
 0x2dd   : > { %p814_p4 = pnand %p819_p2, %p1129_p3 }
 0x2df   : > { %934 = dma.done.wait (!%p814_p4), %s523_s25, 512  }
 0x2e0   : > { %936 = vsyncadd (!%p814_p4), %s523_s25, 4294966784  ;;  %p13_p7 = scmp.ge.s32.totalorder %s999_s15, 6   ;;  %s1130_s9 = smov %s943_s10 }
 0x2e1   : > { %s1131_s10 = smov %s947_s11  ;;  %s1132_s11 = smov %s1010_s18 }
 0x2e2   : > { %s1133_s12 = smov %s999_s15  ;;  %15 = sbr.rel (!%p13_p7) target bundleno = 4 (0x4), region = 68 }
 0x2e9   :  { %528 = vsyncpa [#allocation3], 1 }
 0x2ea   :  { %530 = vsyncpa [#allocation3 + $0x1], 1 }
 0x2eb   :  { %531 = vsyncpa [#allocation4], 1 }
 0x2ec   :  { %533 = vsyncpa [#allocation4 + $0x1], 1 }

</bundles_post_ra>
